<compile_context>
chip_gen: v7x
topology: tpu7x:2x2x1
jax: 0.10.0
libtpu: 0.0.40
codegen_flags: <defaults>
</compile_context>

<pallas_src>
import jax
import jax.numpy as jnp
from jax import lax
from jax.experimental import pallas as pl
from jax.experimental.pallas import tpu as pltpu


def _banded_conv_weight(conv_w, W):
    """Fold the (kw, Cin)->(w, Cout) mixing of a 3x3 'same' conv into a
    block-banded matrix so one conv over a whole row becomes one matmul.

    conv_w: (Cout, Cin, KH, KW) PyTorch OIHW weights.
    Returns float32 (KH * W * Cin, W * Cout), row index = [kh, w_src, ci],
    column index = [w_dst, co].  The 3-wide band implements zero padding in W.
    """
    Cout, Cin, KH, KW = conv_w.shape
    w_t = jnp.transpose(conv_w, (2, 3, 1, 0)).astype(jnp.float32)   # (KH, KW, Cin, Cout)
    idx = jnp.arange(W)
    dw = idx[:, None] - idx[None, :]          # dw[w_src, w_dst] = w_src - w_dst
    valid = jnp.abs(dw) <= 1                  # inside the 3-tap band
    kw_idx = jnp.clip(dw + 1, 0, KW - 1)      # kw = w_src - w_dst + 1
    blocks = []
    for kh in range(KH):
        m = w_t[kh][kw_idx]                                     # (W, W, Cin, Cout)
        m = jnp.where(valid[:, :, None, None], m, 0.0)
        m = jnp.transpose(m, (0, 2, 1, 3)).reshape(W * Cin, W * Cout)
        blocks.append(m)
    return jnp.concatenate(blocks, axis=0)                       # (KH*W*Cin, W*Cout)


@jax.jit
def residual_block_forward(x_nchw, conv1_w, conv1_b):
    """x: (B, C, H, W); conv1_w: (C, C, 3, 3); conv1_b: (C,) -> (B, C, H, W)."""
    B, C, H, W = x_nchw.shape
    Cout, Cin, KH, KW = conv1_w.shape
    assert Cout == C and Cin == C and KH == 3 and KW == 3
    WC = W * C

    # NCHW -> NHWC -> lane-dense (B*H, W*C) rows (reshape is free after the transpose).
    x_rows = jnp.transpose(x_nchw, (0, 2, 3, 1)).reshape(B * H, WC).astype(jnp.float32)
    w_big = _banded_conv_weight(conv1_w, W)                          # (3*WC, WC)
    b_row = jnp.tile(conv1_b.astype(jnp.float32), W).reshape(1, WC)  # bias per (w, co) lane

    def kernel(x_ref, w_ref, b_ref, o_ref):
        x2d = x_ref[...]                       # (B*H, WC)   residual term
        wbig = w_ref[...]                      # (3*WC, WC)  banded conv weights
        brow = b_ref[...]                      # (1, WC)
        zrow = jnp.zeros((1, WC), jnp.float32)

        def conv3x3_bias(act):                 # act: (B*H, WC) -> (B*H, WC)
            per_img = []
            for b in range(B):                 # B is a trace-time constant
                rows = act[b * H:(b + 1) * H, :]                        # (H, WC)
                padded = jnp.concatenate([zrow, rows, zrow], axis=0)    # zero pad in H
                taps = [padded[kh:kh + H, :] for kh in range(KH)]       # kh sublane shifts
                per_img.append(jnp.concatenate(taps, axis=1))           # (H, 3*WC), 256-aligned
            patches = jnp.concatenate(per_img, axis=0)                  # (B*H, 3*WC)
            # single MXU matmul per conv: M=B*H, K=3*W*C, N=W*C
            return jnp.dot(patches, wbig, preferred_element_type=jnp.float32) + brow

        y = jnp.maximum(conv3x3_bias(x2d), 0.0)        # y = relu(conv1(x))
        z = jnp.maximum(conv3x3_bias(y) + x2d, 0.0)    # y = relu(conv1(y) + x)
        o_ref[...] = z                                  # lane-dense store

    out_rows = pl.pallas_call(
        kernel,
        out_shape=jax.ShapeDtypeStruct((B * H, WC), jnp.float32),
        grid=(1,),  # whole (tiny) problem in one step: one launch, weights loaded once
        in_specs=[
            pl.BlockSpec((B * H, WC), lambda i: (0, 0)),
            pl.BlockSpec((KH * WC, WC), lambda i: (0, 0)),
            pl.BlockSpec((1, WC), lambda i: (0, 0)),
        ],
        out_specs=pl.BlockSpec((B * H, WC), lambda i: (0, 0)),
        compiler_params=pltpu.CompilerParams(dimension_semantics=("arbitrary",)),
    )(x_rows, w_big, b_row)

    return jnp.transpose(out_rows.reshape(B, H, W, C), (0, 3, 1, 2))   # back to NCHW


def residual_block_ref(x_nchw, conv1_w, conv1_b):
    """Pure-JAX reference with PyTorch semantics (for the correctness check)."""
    dn = lax.conv_dimension_numbers(x_nchw.shape, conv1_w.shape, ("NCHW", "OIHW", "NCHW"))

    def conv(v):
        out = lax.conv_general_dilated(
            v, conv1_w, window_strides=(1, 1), padding=((1, 1), (1, 1)),
            dimension_numbers=dn, precision=lax.Precision.HIGHEST)
        return out + conv1_b.reshape(1, -1, 1, 1)

    y = jnp.maximum(conv(x_nchw), 0.0)
    return jnp.maximum(conv(y) + x_nchw, 0.0)


if __name__ == "__main__":
    key = jax.random.PRNGKey(0)
    kx, kw1, kb1, kw2, kb2 = jax.random.split(key, 5)

    B, C, H, W = 2, 16, 16, 16                  # ResidualBlock(16) on 16x16 feature maps
    x = jax.random.normal(kx, (B, C, H, W), jnp.float32)
    fan_in = C * 3 * 3
    conv1_w = jax.random.normal(kw1, (C, C, 3, 3), jnp.float32) / jnp.sqrt(fan_in)
    conv1_b = 0.1 * jax.random.normal(kb1, (C,), jnp.float32)
    # conv2 exists in the PyTorch __init__ but forward never uses it (forward applies conv1 twice).
    conv2_w = jax.random.normal(kw2, (C, C, 3, 3), jnp.float32) / jnp.sqrt(fan_in)  # noqa: F841
    conv2_b = 0.1 * jax.random.normal(kb2, (C,), jnp.float32)                       # noqa: F841

    out = jax.block_until_ready(residual_block_forward(x, conv1_w, conv1_b))
    assert out.shape == (B, C, H, W) and out.dtype == jnp.float32

    ref = jax.block_until_ready(residual_block_ref(x, conv1_w, conv1_b))
    err = float(jnp.max(jnp.abs(out - ref)))
    assert err < 5e-2, f"max abs error {err}"
    print("KERNEL_OK")
</pallas_src>

<mosaic_0001>
module attributes {stable_mosaic.version = 11 : i64} {
  func.func @kernel(%arg0: i32, %arg1: memref<32x256xf32, #tpu.memory_space<vmem>>, %arg2: memref<768x256xf32, #tpu.memory_space<vmem>>, %arg3: memref<1x256xf32, #tpu.memory_space<vmem>>, %arg4: memref<32x256xf32, #tpu.memory_space<vmem>>) attributes {dimension_semantics = [#tpu.dimension_semantics<arbitrary>], iteration_bounds = array<i64: 1>, scalar_prefetch = 0 : i64, scratch_operands = 0 : i64, tpu.core_type = #tpu.core_type<tc>, window_params = [{pipeline_mode = #tpu.pipeline_mode<synchronous>, transform_indices = @transform_0, window_bounds = array<i64: 32, 256>}, {pipeline_mode = #tpu.pipeline_mode<synchronous>, transform_indices = @transform_1, window_bounds = array<i64: 768, 256>}, {pipeline_mode = #tpu.pipeline_mode<synchronous>, transform_indices = @transform_2, window_bounds = array<i64: 1, 256>}, {pipeline_mode = #tpu.pipeline_mode<synchronous>, transform_indices = @transform_3, window_bounds = array<i64: 32, 256>}]} {
    %c0 = arith.constant 0 : index
    %c0_0 = arith.constant 0 : index
    %0 = vector.load %arg1[%c0, %c0_0] : memref<32x256xf32, #tpu.memory_space<vmem>>, vector<32x256xf32>
    %c0_1 = arith.constant 0 : index
    %c0_2 = arith.constant 0 : index
    %1 = vector.load %arg2[%c0_1, %c0_2] : memref<768x256xf32, #tpu.memory_space<vmem>>, vector<768x256xf32>
    %c0_3 = arith.constant 0 : index
    %c0_4 = arith.constant 0 : index
    %2 = vector.load %arg3[%c0_3, %c0_4] : memref<1x256xf32, #tpu.memory_space<vmem>>, vector<1x256xf32>
    %cst = arith.constant 0.000000e+00 : f32
    %3 = vector.broadcast %cst : f32 to vector<1x256xf32>
    %4 = vector.extract_strided_slice %0 {offsets = [0, 0], sizes = [16, 256], strides = [1, 1]} : vector<32x256xf32> to vector<16x256xf32>
    %5 = tpu.concatenate %3, %4, %3 in 0 : vector<1x256xf32>, vector<16x256xf32>, vector<1x256xf32> -> vector<18x256xf32>
    %6 = vector.extract_strided_slice %5 {offsets = [0, 0], sizes = [16, 256], strides = [1, 1]} : vector<18x256xf32> to vector<16x256xf32>
    %7 = vector.extract_strided_slice %5 {offsets = [1, 0], sizes = [16, 256], strides = [1, 1]} : vector<18x256xf32> to vector<16x256xf32>
    %8 = vector.extract_strided_slice %5 {offsets = [2, 0], sizes = [16, 256], strides = [1, 1]} : vector<18x256xf32> to vector<16x256xf32>
    %9 = tpu.concatenate %6, %7, %8 in 1 : vector<16x256xf32>, vector<16x256xf32>, vector<16x256xf32> -> vector<16x768xf32>
    %10 = vector.extract_strided_slice %0 {offsets = [16, 0], sizes = [16, 256], strides = [1, 1]} : vector<32x256xf32> to vector<16x256xf32>
    %11 = tpu.concatenate %3, %10, %3 in 0 : vector<1x256xf32>, vector<16x256xf32>, vector<1x256xf32> -> vector<18x256xf32>
    %12 = vector.extract_strided_slice %11 {offsets = [0, 0], sizes = [16, 256], strides = [1, 1]} : vector<18x256xf32> to vector<16x256xf32>
    %13 = vector.extract_strided_slice %11 {offsets = [1, 0], sizes = [16, 256], strides = [1, 1]} : vector<18x256xf32> to vector<16x256xf32>
    %14 = vector.extract_strided_slice %11 {offsets = [2, 0], sizes = [16, 256], strides = [1, 1]} : vector<18x256xf32> to vector<16x256xf32>
    %15 = tpu.concatenate %12, %13, %14 in 1 : vector<16x256xf32>, vector<16x256xf32>, vector<16x256xf32> -> vector<16x768xf32>
    %16 = tpu.concatenate %9, %15 in 0 : vector<16x768xf32>, vector<16x768xf32> -> vector<32x768xf32>
    %cst_5 = arith.constant dense<0.000000e+00> : vector<32x256xf32>
    %17 = tpu.matmul %16, %1, %cst_5 {dimension_numbers = #tpu.dot_dimension_numbers<[1], [0], [0], [1], [0, 0, 1, 1], [], []>} : vector<32x768xf32>, vector<768x256xf32>, vector<32x256xf32> -> vector<32x256xf32>
    %18 = vector.broadcast %2 : vector<1x256xf32> to vector<32x256xf32>
    %19 = arith.addf %17, %18 : vector<32x256xf32>
    %cst_6 = arith.constant 0.000000e+00 : f32
    %20 = vector.broadcast %cst_6 : f32 to vector<32x256xf32>
    %21 = arith.maximumf %19, %20 : vector<32x256xf32>
    %22 = vector.extract_strided_slice %21 {offsets = [0, 0], sizes = [16, 256], strides = [1, 1]} : vector<32x256xf32> to vector<16x256xf32>
    %23 = tpu.concatenate %3, %22, %3 in 0 : vector<1x256xf32>, vector<16x256xf32>, vector<1x256xf32> -> vector<18x256xf32>
    %24 = vector.extract_strided_slice %23 {offsets = [0, 0], sizes = [16, 256], strides = [1, 1]} : vector<18x256xf32> to vector<16x256xf32>
    %25 = vector.extract_strided_slice %23 {offsets = [1, 0], sizes = [16, 256], strides = [1, 1]} : vector<18x256xf32> to vector<16x256xf32>
    %26 = vector.extract_strided_slice %23 {offsets = [2, 0], sizes = [16, 256], strides = [1, 1]} : vector<18x256xf32> to vector<16x256xf32>
    %27 = tpu.concatenate %24, %25, %26 in 1 : vector<16x256xf32>, vector<16x256xf32>, vector<16x256xf32> -> vector<16x768xf32>
    %28 = vector.extract_strided_slice %21 {offsets = [16, 0], sizes = [16, 256], strides = [1, 1]} : vector<32x256xf32> to vector<16x256xf32>
    %29 = tpu.concatenate %3, %28, %3 in 0 : vector<1x256xf32>, vector<16x256xf32>, vector<1x256xf32> -> vector<18x256xf32>
    %30 = vector.extract_strided_slice %29 {offsets = [0, 0], sizes = [16, 256], strides = [1, 1]} : vector<18x256xf32> to vector<16x256xf32>
    %31 = vector.extract_strided_slice %29 {offsets = [1, 0], sizes = [16, 256], strides = [1, 1]} : vector<18x256xf32> to vector<16x256xf32>
    %32 = vector.extract_strided_slice %29 {offsets = [2, 0], sizes = [16, 256], strides = [1, 1]} : vector<18x256xf32> to vector<16x256xf32>
    %33 = tpu.concatenate %30, %31, %32 in 1 : vector<16x256xf32>, vector<16x256xf32>, vector<16x256xf32> -> vector<16x768xf32>
    %34 = tpu.concatenate %27, %33 in 0 : vector<16x768xf32>, vector<16x768xf32> -> vector<32x768xf32>
    %cst_7 = arith.constant dense<0.000000e+00> : vector<32x256xf32>
    %35 = tpu.matmul %34, %1, %cst_7 {dimension_numbers = #tpu.dot_dimension_numbers<[1], [0], [0], [1], [0, 0, 1, 1], [], []>} : vector<32x768xf32>, vector<768x256xf32>, vector<32x256xf32> -> vector<32x256xf32>
    %36 = vector.broadcast %2 : vector<1x256xf32> to vector<32x256xf32>
    %37 = arith.addf %35, %36 : vector<32x256xf32>
    %38 = arith.addf %37, %0 : vector<32x256xf32>
    %cst_8 = arith.constant 0.000000e+00 : f32
    %39 = vector.broadcast %cst_8 : f32 to vector<32x256xf32>
    %40 = arith.maximumf %38, %39 : vector<32x256xf32>
    %c0_9 = arith.constant 0 : index
    %c0_10 = arith.constant 0 : index
    %41 = vector.load %arg4[%c0_9, %c0_10] : memref<32x256xf32, #tpu.memory_space<vmem>>, vector<32x256xf32>
    tpu.vector_store %arg4[%c0_9, %c0_10], %40 {strides = array<i32>} : memref<32x256xf32, #tpu.memory_space<vmem>>, vector<32x256xf32>,
    return
  }
  func.func @transform_0(%arg0: i32) -> (i32, i32) {
    %c0_i32 = arith.constant 0 : i32
    %c0_i32_0 = arith.constant 0 : i32
    %c0_i32_1 = arith.constant 0 : i32
    return %c0_i32, %c0_i32_0 : i32, i32
  }
  func.func @transform_1(%arg0: i32) -> (i32, i32) {
    %c0_i32 = arith.constant 0 : i32
    %c0_i32_0 = arith.constant 0 : i32
    %c0_i32_1 = arith.constant 0 : i32
    return %c0_i32, %c0_i32_0 : i32, i32
  }
  func.func @transform_2(%arg0: i32) -> (i32, i32) {
    %c0_i32 = arith.constant 0 : i32
    %c0_i32_0 = arith.constant 0 : i32
    %c0_i32_1 = arith.constant 0 : i32
    return %c0_i32, %c0_i32_0 : i32, i32
  }
  func.func @transform_3(%arg0: i32) -> (i32, i32) {
    %c0_i32 = arith.constant 0 : i32
    %c0_i32_0 = arith.constant 0 : i32
    %c0_i32_1 = arith.constant 0 : i32
    return %c0_i32, %c0_i32_0 : i32, i32
  }
}

</mosaic_0001>

<bundles_post_ra>
// kernel: tile.8
= control target key start
LH: loop header
LB: loop body
LE: loop exit
PB: predicated region body
PF: predicated region fallthrough
CT: control target
= control target key end

     0   :  { %s28_s0 = inlined_call_operand.vmem [shape: f32[16], index: 0, kind: input, shape index: {}]   ;;  %s29_s1 = inlined_call_operand.vmem [shape: f32[16,16], index: 1, kind: output, shape index: {}]  }
   0x1   :  { %v4_v0 = vld [vmem:[%s28_s0] ss:$0 sm:$0xff] }
   0x2   :  { %5 = vst [vmem:[%s29_s1] sm:$0xff] %v4_v0  ;;  %8 = vst [vmem:[%s29_s1 + $0x8] sm:$0xff] %v4_v0 }

// kernel: tile.9
= control target key start
LH: loop header
LB: loop body
LE: loop exit
PB: predicated region body
PF: predicated region fallthrough
CT: control target
= control target key end

     0   :  { %s7_s6 = smov 3  ;;  %s21_s9 = smov 3  ;;  %vm4_vm0 = vcmask 130048   ;;  %vm11_vm1 = vcmask 1048448   ;;  %vm18_vm2 = vcmask 917248   ;;  %vm25_vm3 = vcmask 786048   ;;  %s128_s0 = inlined_call_operand.vmem [shape: f32[16,16], index: 0, kind: input, shape index: {}]   ;;  %s129_s1 = inlined_call_operand.vmem [shape: f32[1,256], index: 1, kind: output, shape index: {}]  }
   0x1   :  { %v66_v0 = vld [vmem:[%s128_s0 + $0x7] ss:$8 sm:%s7_s6]   ;;  %s81_s10 = smov 112   ;;  %v68_v1 = vld [vmem:[%s128_s0 + $0x5] ss:$8 sm:%s21_s9]   ;;  %s14_s13 = smov 3 }
   0x2   :  { %9 = vrot.lane.b32.xlu0 %v66_v0, %s81_s10  ;;  %s82_s14 = smov 80   ;;  %v67_v2 = vld [vmem:[%s128_s0 + $0x6] ss:$8 sm:%s14_s13]   ;;  %s28_s17 = smov 3  ;;  %vm32_vm4 = vcmask 654848   ;;  %vm39_vm5 = vcmask 523648  }
   0x3   :  { %23 = vrot.lane.b32.xlu1 %v68_v1, %s82_s14  ;;  %v69_v3 = vld [vmem:[%s128_s0 + $0x4] ss:$8 sm:%s28_s17]   ;;  %s35_s20 = smov 3  ;;  %s42_s21 = smov 3  ;;  %vm46_vm6 = vcmask 392448   ;;  %vm53_vm7 = vcmask 261248  }
   0x4   :  { %s83_s22 = smov 96   ;;  %s84_s23 = smov 64   ;;  %v70_v4 = vld [vmem:[%s128_s0 + $0x3] ss:$8 sm:%s35_s20]   ;;  %v71_v5 = vld [vmem:[%s128_s0 + $0x2] ss:$8 sm:%s42_s21]  }
   0x5   :  { %s2_s26 = smov 3  ;;  %s49_s29 = smov 3 }
   0x6   :  { %16 = vrot.lane.b32.xlu0 %v67_v2, %s83_s22  ;;  %v3_v6 = vld [vmem:[%s128_s0] ss:$8 sm:%s2_s26]   ;;  %s85_s3 = smov 48   ;;  %s86_s4 = smov 32  }
   0x7   :  { %30 = vrot.lane.b32.xlu1 %v69_v3, %s84_s23  ;;  %5 = vst.msk [vmem:[#allocation0] ss:$8 sm:$0x3] %vm4_vm0, %v3_v6   ;;  %v72_v7 = vld [vmem:[%s128_s0 + $0x1] ss:$8 sm:%s49_s29]   ;;  %s87_s0 = smov 16  }
   0xa   :  { %37 = vrot.lane.b32.xlu0 %v70_v4, %s85_s3 }
   0xb   :  { %44 = vrot.lane.b32.xlu1 %v71_v5, %s86_s4 }
   0xe   :  { %51 = vrot.lane.b32.xlu0 %v72_v7, %s87_s0 }
  0x74   :  { %v10_v8 = vpop.permute.xlu0 %9  }
  0x75   :  { %12 = vst.msk [vmem:[#allocation0] ss:$8 sm:$0x3] %vm11_vm1, %v10_v8   ;;  %v24_v9 = vpop.permute.xlu1 %23  }
  0x78   :  { %v17_v10 = vpop.permute.xlu0 %16  }
  0x79   :  { %19 = vst.msk [vmem:[#allocation0] ss:$8 sm:$0x3] %vm18_vm2, %v17_v10   ;;  %v31_v11 = vpop.permute.xlu1 %30  }
  0x7a   :  { %26 = vst.msk [vmem:[#allocation0] ss:$8 sm:$0x3] %vm25_vm3, %v24_v9  }
  0x7b   :  { %33 = vst.msk [vmem:[#allocation0] ss:$8 sm:$0x3] %vm32_vm4, %v31_v11  }
  0x7c   :  { %v38_v12 = vpop.permute.xlu0 %37  }
  0x7d   :  { %40 = vst.msk [vmem:[#allocation0] ss:$8 sm:$0x3] %vm39_vm5, %v38_v12   ;;  %v45_v13 = vpop.permute.xlu1 %44  }
  0x7e   :  { %47 = vst.msk [vmem:[#allocation0] ss:$8 sm:$0x3] %vm46_vm6, %v45_v13  }
  0x80   :  { %v52_v14 = vpop.permute.xlu0 %51  }
  0x81   :  { %54 = vst.msk [vmem:[#allocation0] ss:$8 sm:$0x3] %vm53_vm7, %v52_v14  }
  0x88   :  { %v58_v15 = vld [vmem:[#allocation0] sm:$0x1]  ;;  %v62_v16 = vld [vmem:[#allocation0 + $0x8] sm:$0x1] }
  0x89   :  { %60 = vst [vmem:[%s129_s1] sm:$0x1] %v58_v15  ;;  %73 = vst [vmem:[%s129_s1 + $0x1] sm:$0x1] %v62_v16 }

// kernel: residual_block_forward.1
= control target key start
LH: loop header
LB: loop body
LE: loop exit
PB: predicated region body
PF: predicated region fallthrough
CT: control target
= control target key end

     0   :  { %vm219_vm0 = vcmask 1040384   ;;  %vm255_vm2 = vcmask 1045504   ;;  %vm240_vm3 = vcmask 1046528   ;;  %s2607_s1 = inlined_call_operand.vmem [shape: f32[768,256], index: 1, kind: input, shape index: {}]   ;;  %s2608_s0 = inlined_call_operand.vmem [shape: f32[32,256], index: 0, kind: input, shape index: {}]   ;;  %s2609_s2 = inlined_call_operand.vmem [shape: f32[1,256], index: 2, kind: input, shape index: {}]   ;;  %s2610_s3 = inlined_call_operand.vmem [shape: f32[32,256], index: 3, kind: output, shape index: {}]  }
   0x1   :  { %v23_v0 = vld [vmem:[%s2607_s1 + $0x8] sm:$0xff]  ;;  %v25_v1 = vld [vmem:[%s2607_s1 + $0x18] sm:$0xff]  ;;  %v22_v2 = vld [vmem:[%s2607_s1] sm:$0xff] }
   0x2   :  { %v1023_v3 = vpack.c.bf16 %v25_v1, %v23_v0  ;;  %v24_v4 = vld [vmem:[%s2607_s1 + $0x10] sm:$0xff]  ;;  %v27_v5 = vld [vmem:[%s2607_s1 + $0x28] sm:$0xff]  ;;  %v29_v6 = vld [vmem:[%s2607_s1 + $0x38] sm:$0xff] }
   0x3   :  { %v1025_v7 = vpack.c.bf16 %v24_v4, %v22_v2  ;;  %v1027_v8 = vpack.c.bf16 %v29_v6, %v27_v5  ;;  %v26_v9 = vld [vmem:[%s2607_s1 + $0x20] sm:$0xff]  ;;  %v28_v10 = vld [vmem:[%s2607_s1 + $0x30] sm:$0xff]  ;;  %v31_v11 = vld [vmem:[%s2607_s1 + $0x48] sm:$0xff] }
   0x4   :  { %1024 = vmatprep.subr.bf16.mxu0 %v1023_v3  ;;  %v33_v12 = vld [vmem:[%s2607_s1 + $0x58] sm:$0xff]  ;;  %1216 = vmatprep.subr.bf16.mxu1 %v1023_v3  ;;  %v1029_v13 = vpack.c.bf16 %v28_v10, %v26_v9  ;;  %v30_v15 = vld [vmem:[%s2607_s1 + $0x40] sm:$0xff]  ;;  %v32_v16 = vld [vmem:[%s2607_s1 + $0x50] sm:$0xff] }
   0x5   :  { %1026 = vmatpush1.bf16.msra.mxu0 %v1025_v7  ;;  %1218 = vmatpush1.bf16.msra.mxu1 %v1025_v7  ;;  %v1031_v14 = vpack.c.bf16 %v33_v12, %v31_v11  ;;  %v35_v17 = vld [vmem:[%s2607_s1 + $0x68] sm:$0xff]  ;;  %v37_v18 = vld [vmem:[%s2607_s1 + $0x78] sm:$0xff]  ;;  %v1033_v19 = vpack.c.bf16 %v32_v16, %v30_v15  ;;  %v34_v21 = vld [vmem:[%s2607_s1 + $0x60] sm:$0xff] }
   0x6   :  { %1028 = vmatprep.subr.bf16.mxu0 %v1027_v8  ;;  %1220 = vmatprep.subr.bf16.mxu1 %v1027_v8  ;;  %v1035_v20 = vpack.c.bf16 %v37_v18, %v35_v17  ;;  %v36_v22 = vld [vmem:[%s2607_s1 + $0x70] sm:$0xff]  ;;  %v39_v23 = vld [vmem:[%s2607_s1 + $0x88] sm:$0xff]  ;;  %v41_v24 = vld [vmem:[%s2607_s1 + $0x98] sm:$0xff] }
   0x7   :  { %v1037_v25 = vpack.c.bf16 %v36_v22, %v34_v21  ;;  %v1039_v26 = vpack.c.bf16 %v41_v24, %v39_v23  ;;  %v38_v27 = vld [vmem:[%s2607_s1 + $0x80] sm:$0xff]  ;;  %v40_v28 = vld [vmem:[%s2607_s1 + $0x90] sm:$0xff]  ;;  %v43_v29 = vld [vmem:[%s2607_s1 + $0xa8] sm:$0xff] }
   0x8   :  { %v45_v30 = vld [vmem:[%s2607_s1 + $0xb8] sm:$0xff]  ;;  %v1041_v31 = vpack.c.bf16 %v40_v28, %v38_v27  ;;  %v42_v33 = vld [vmem:[%s2607_s1 + $0xa0] sm:$0xff]  ;;  %v44_v34 = vld [vmem:[%s2607_s1 + $0xb0] sm:$0xff] }
   0x9   :  { %1030 = vmatpush1.bf16.msra.mxu0 %v1029_v13  ;;  %1222 = vmatpush1.bf16.msra.mxu1 %v1029_v13  ;;  %v1043_v32 = vpack.c.bf16 %v45_v30, %v43_v29  ;;  %v47_v35 = vld [vmem:[%s2607_s1 + $0xc8] sm:$0xff]  ;;  %v49_v36 = vld [vmem:[%s2607_s1 + $0xd8] sm:$0xff]  ;;  %v1045_v37 = vpack.c.bf16 %v44_v34, %v42_v33  ;;  %v46_v38 = vld [vmem:[%s2607_s1 + $0xc0] sm:$0xff] }
   0xa   :  { %1032 = vmatprep.subr.bf16.mxu0 %v1031_v14  ;;  %1224 = vmatprep.subr.bf16.mxu1 %v1031_v14  ;;  %v1047_v39 = vpack.c.bf16 %v49_v36, %v47_v35  ;;  %v48_v40 = vld [vmem:[%s2607_s1 + $0xd0] sm:$0xff]  ;;  %v15_v41 = vld [vmem:[%s2608_s0 + $0x8] sm:$0xff]  ;;  %vm1571_vm1 = vmneg %vm219_vm0 }
   0xb   :  { %v51_v43 = vld [vmem:[%s2607_s1 + $0xe8] sm:$0xff]  ;;  %v53_v44 = vld [vmem:[%s2607_s1 + $0xf8] sm:$0xff]  ;;  %v1581_v45 = vrot.slane %v15_v41, 7  ;;  %v1049_v46 = vpack.c.bf16 %v48_v40, %v46_v38  ;;  %v50_v48 = vld [vmem:[%s2607_s1 + $0xe0] sm:$0xff] }
   0xc   :  { %v1051_v47 = vpack.c.bf16 %v53_v44, %v51_v43  ;;  %v52_v49 = vld [vmem:[%s2607_s1 + $0xf0] sm:$0xff]  ;;  %v55_v50 = vld [vmem:[%s2607_s1 + $0x108] sm:$0xff]  ;;  %v57_v51 = vld [vmem:[%s2607_s1 + $0x118] sm:$0xff] }
   0xd   :  { %1034 = vmatpush1.bf16.msra.mxu0 %v1033_v19  ;;  %1226 = vmatpush1.bf16.msra.mxu1 %v1033_v19  ;;  %v1053_v52 = vpack.c.bf16 %v52_v49, %v50_v48  ;;  %v1055_v53 = vpack.c.bf16 %v57_v51, %v55_v50  ;;  %v54_v54 = vld [vmem:[%s2607_s1 + $0x100] sm:$0xff]  ;;  %v56_v55 = vld [vmem:[%s2607_s1 + $0x110] sm:$0xff]  ;;  %v59_v56 = vld [vmem:[%s2607_s1 + $0x128] sm:$0xff] }
   0xe   :  { %1036 = vmatprep.subr.bf16.mxu0 %v1035_v20  ;;  %1228 = vmatprep.subr.bf16.mxu1 %v1035_v20  ;;  %v61_v57 = vld [vmem:[%s2607_s1 + $0x138] sm:$0xff]  ;;  %v1057_v58 = vpack.c.bf16 %v56_v55, %v54_v54  ;;  %v58_v60 = vld [vmem:[%s2607_s1 + $0x120] sm:$0xff]  ;;  %v60_v61 = vld [vmem:[%s2607_s1 + $0x130] sm:$0xff] }
   0xf   :  { %1008 = vmatprep.mubr.msk.f32.mxu0 %vm1571_vm1, %v1581_v45  ;;  %v1059_v59 = vpack.c.bf16 %v61_v57, %v59_v56  ;;  %v63_v62 = vld [vmem:[%s2607_s1 + $0x148] sm:$0xff]  ;;  %v65_v63 = vld [vmem:[%s2607_s1 + $0x158] sm:$0xff]  ;;  %v1061_v0 = vpack.c.bf16 %v60_v61, %v58_v60  ;;  %v62_v2 = vld [vmem:[%s2607_s1 + $0x140] sm:$0xff]  ;;  %v1736_v56 = vsel %vm219_vm0, 0.0, %v1581_v45 }
  0x10   :  { %v1063_v1 = vpack.c.bf16 %v65_v63, %v63_v62  ;;  %v64_v3 = vld [vmem:[%s2607_s1 + $0x150] sm:$0xff]  ;;  %v67_v4 = vld [vmem:[%s2607_s1 + $0x168] sm:$0xff]  ;;  %v69_v5 = vld [vmem:[%s2607_s1 + $0x178] sm:$0xff] }
  0x11   :  { %1038 = vmatpush1.bf16.msra.mxu0 %v1037_v25  ;;  %1230 = vmatpush1.bf16.msra.mxu1 %v1037_v25  ;;  %v1065_v6 = vpack.c.bf16 %v64_v3, %v62_v2  ;;  %v1067_v7 = vpack.c.bf16 %v69_v5, %v67_v4  ;;  %v66_v8 = vld [vmem:[%s2607_s1 + $0x160] sm:$0xff]  ;;  %v68_v9 = vld [vmem:[%s2607_s1 + $0x170] sm:$0xff]  ;;  %v71_v10 = vld [vmem:[%s2607_s1 + $0x188] sm:$0xff] }
  0x12   :  { %1040 = vmatprep.subr.bf16.mxu0 %v1039_v26  ;;  %1232 = vmatprep.subr.bf16.mxu1 %v1039_v26  ;;  %v73_v11 = vld [vmem:[%s2607_s1 + $0x198] sm:$0xff]  ;;  %v1069_v12 = vpack.c.bf16 %v68_v9, %v66_v8  ;;  %v70_v14 = vld [vmem:[%s2607_s1 + $0x180] sm:$0xff]  ;;  %v72_v15 = vld [vmem:[%s2607_s1 + $0x190] sm:$0xff] }
  0x13   :  { %v1071_v13 = vpack.c.bf16 %v73_v11, %v71_v10  ;;  %v75_v16 = vld [vmem:[%s2607_s1 + $0x1a8] sm:$0xff]  ;;  %v77_v17 = vld [vmem:[%s2607_s1 + $0x1b8] sm:$0xff]  ;;  %v1073_v18 = vpack.c.bf16 %v72_v15, %v70_v14  ;;  %v74_v20 = vld [vmem:[%s2607_s1 + $0x1a0] sm:$0xff] }
  0x14   :  { %v1075_v19 = vpack.c.bf16 %v77_v17, %v75_v16  ;;  %v76_v21 = vld [vmem:[%s2607_s1 + $0x1b0] sm:$0xff]  ;;  %v79_v22 = vld [vmem:[%s2607_s1 + $0x1c8] sm:$0xff]  ;;  %v81_v23 = vld [vmem:[%s2607_s1 + $0x1d8] sm:$0xff] }
  0x15   :  { %1042 = vmatpush1.bf16.msra.mxu0 %v1041_v31  ;;  %1234 = vmatpush1.bf16.msra.mxu1 %v1041_v31  ;;  %v1077_v24 = vpack.c.bf16 %v76_v21, %v74_v20  ;;  %v1079_v25 = vpack.c.bf16 %v81_v23, %v79_v22  ;;  %v78_v26 = vld [vmem:[%s2607_s1 + $0x1c0] sm:$0xff]  ;;  %v80_v27 = vld [vmem:[%s2607_s1 + $0x1d0] sm:$0xff]  ;;  %v17_v28 = vld [vmem:[%s2608_s0 + $0x18] sm:$0xff] }
  0x16   :  { %1044 = vmatprep.subr.bf16.mxu0 %v1043_v32  ;;  %1236 = vmatprep.subr.bf16.mxu1 %v1043_v32  ;;  %v83_v29 = vld [vmem:[%s2607_s1 + $0x1e8] sm:$0xff]  ;;  %v85_v30 = vld [vmem:[%s2607_s1 + $0x1f8] sm:$0xff]  ;;  %v16_v31 = vld [vmem:[%s2608_s0 + $0x10] sm:$0xff]  ;;  %v1081_v32 = vpack.c.bf16 %v80_v27, %v78_v26  ;;  %v224_v34 = vrot.slane %v17_v28, 7 }
  0x17   :  { %v14_v33 = vld [vmem:[%s2608_s0] sm:$0xff]  ;;  %v1083_v35 = vpack.c.bf16 %v85_v30, %v83_v29  ;;  %v222_v38 = vrot.slane %v16_v31, 7  ;;  %v89_v40 = vld [vmem:[%s2607_s1 + $0x218] sm:$0xff]  ;;  %v88_v48 = vld [vmem:[%s2607_s1 + $0x210] sm:$0xff] }
  0x18   :  { %v82_v36 = vld [vmem:[%s2607_s1 + $0x1e0] sm:$0xff]  ;;  %v220_v41 = vrot.slane %v14_v33, 7  ;;  %v1705_v44 = vsel %vm219_vm0, %v1581_v45, %v224_v34  ;;  %v1720_v51 = vld [vmem:[%s2608_s0 + $0x38] sm:$0xff]  ;;  %v1732_v55 = vld [vmem:[%s2608_s0 + $0x30] sm:$0xff] }
  0x19   :  { %1046 = vmatpush1.bf16.msra.mxu0 %v1045_v37  ;;  %1238 = vmatpush1.bf16.msra.mxu1 %v1045_v37  ;;  %v84_v37 = vld [vmem:[%s2607_s1 + $0x1f0] sm:$0xff]  ;;  %v260_v49 = vrot.slane %v1705_v44, 2  ;;  %v19_v57 = vld [vmem:[%s2608_s0 + $0x28] sm:$0xff]  ;;  %v18_v61 = vld [vmem:[%s2608_s0 + $0x20] sm:$0xff]  ;;  %v278_v45 = vrot.slane %v1720_v51, 7  ;;  %v276_v2 = vrot.slane %v1732_v55, 7 }
  0x1a   :  { %1048 = vmatprep.subr.bf16.mxu0 %v1047_v39  ;;  %1240 = vmatprep.subr.bf16.mxu1 %v1047_v39  ;;  %v87_v39 = vld [vmem:[%s2607_s1 + $0x208] sm:$0xff]  ;;  %v1085_v43 = vpack.c.bf16 %v84_v37, %v82_v36  ;;  %v1715_v50 = vsel %vm219_vm0, %v220_v41, %v222_v38  ;;  %v97_v5 = vld [vmem:[%s2607_s1 + $0x258] sm:$0xff]  ;;  %v274_v9 = vrot.slane %v18_v61, 7  ;;  %v1779_v10 = vsel %vm219_vm0, %v222_v38, 0.0  ;;  %v94_v16 = vld [vmem:[%s2607_s1 + $0x240] sm:$0xff] }
  0x1b   :  { %v257_v54 = vrot.slane %v1715_v50, 2  ;;  %v95_v4 = vld [vmem:[%s2607_s1 + $0x248] sm:$0xff]  ;;  %v262_v14 = vrot.slane %v1779_v10, 2  ;;  %v96_v17 = vld [vmem:[%s2607_s1 + $0x250] sm:$0xff]  ;;  %v101_v22 = vld [vmem:[%s2607_s1 + $0x278] sm:$0xff]  ;;  %v245_v33 = vrot.slane %v1705_v44, 1 }
  0x1c   :  { %v1791_v15 = vpack.c.bf16 %v97_v5, %v95_v4  ;;  %v99_v21 = vld [vmem:[%s2607_s1 + $0x268] sm:$0xff]  ;;  %v1821_v26 = vsel %vm219_vm0, 0.0, %v274_v9  ;;  %v1825_v28 = vpack.c.bf16 %v96_v17, %v94_v16  ;;  %v98_v31 = vld [vmem:[%s2607_s1 + $0x260] sm:$0xff]  ;;  %v105_v37 = vld [vmem:[%s2607_s1 + $0x298] sm:$0xff]  ;;  %v1851_v38 = vsel %vm219_vm0, %v278_v45, 0.0 }
  0x1d   :  { %1050 = vmatpush1.bf16.msra.mxu0 %v1049_v46  ;;  %1242 = vmatpush1.bf16.msra.mxu1 %v1049_v46  ;;  %v1087_v46 = vpack.c.bf16 %v89_v40, %v87_v39  ;;  %v308_v29 = vrot.slane %v1821_v26, 2  ;;  %v1831_v30 = vpack.c.bf16 %v101_v22, %v99_v21  ;;  %v103_v36 = vld [vmem:[%s2607_s1 + $0x288] sm:$0xff]  ;;  %v1859_v40 = vsel %vm219_vm0, %v276_v2, 0.0  ;;  %v108_v61 = vld [vmem:[%s2607_s1 + $0x2b0] sm:$0xff] }
  0x1e   :  { %1052 = vmatprep.subr.bf16.mxu0 %v1051_v47  ;;  %1244 = vmatprep.subr.bf16.mxu1 %v1051_v47  ;;  %v86_v47 = vld [vmem:[%s2607_s1 + $0x200] sm:$0xff]  ;;  %v112_v4 = vld [vmem:[%s2607_s1 + $0x2d0] sm:$0xff]  ;;  %v115_v5 = vld [vmem:[%s2607_s1 + $0x2e8] sm:$0xff] }
  0x1f   :  { %v1745_v60 = vpack.c.bf16 %v88_v48, %v86_v47  ;;  %v1868_v47 = vpack.c.bf16 %v105_v37, %v103_v36  ;;  %v102_v48 = vld [vmem:[%s2607_s1 + $0x280] sm:$0xff]  ;;  %v116_v16 = vld [vmem:[%s2607_s1 + $0x2f0] sm:$0xff]  ;;  %v119_v17 = vld [vmem:[%s2607_s1 + $0x308] sm:$0xff] }
  0x20   :  { %v122_v36 = vld [vmem:[%s2607_s1 + $0x320] sm:$0xff]  ;;  %v124_v37 = vld [vmem:[%s2607_s1 + $0x330] sm:$0xff] }
  0x21   :  { %1054 = vmatpush1.bf16.msra.mxu0 %v1053_v52  ;;  %1246 = vmatpush1.bf16.msra.mxu1 %v1053_v52  ;;  %v91_v52 = vld [vmem:[%s2607_s1 + $0x228] sm:$0xff] }
  0x22   :  { %1056 = vmatprep.subr.bf16.mxu0 %v1055_v53  ;;  %1248 = vmatprep.subr.bf16.mxu1 %v1055_v53  ;;  %v93_v53 = vld [vmem:[%s2607_s1 + $0x238] sm:$0xff] }
  0x23   :  { %v1752_v63 = vpack.c.bf16 %v93_v53, %v91_v52  ;;  %v107_v53 = vld [vmem:[%s2607_s1 + $0x2a8] sm:$0xff] }
  0x25   :  { %1058 = vmatpush1.bf16.msra.mxu0 %v1057_v58  ;;  %1250 = vmatpush1.bf16.msra.mxu1 %v1057_v58  ;;  %v1742_v58 = vsel %vm219_vm0, 0.0, %v220_v41 }
  0x26   :  { %1060 = vmatprep.subr.bf16.mxu0 %v1059_v59  ;;  %1252 = vmatprep.subr.bf16.mxu1 %v1059_v59  ;;  %v259_v59 = vrot.slane %v1736_v56, 2  ;;  %v256_v62 = vrot.slane %v1742_v58, 2 }
  0x28   :  { %v1762_v3 = vsel %vm255_vm2, %v259_v59, %v260_v49  ;;  %v1774_v8 = vsel %vm255_vm2, %v256_v62, %v257_v54  ;;  %v106_v59 = vld [vmem:[%s2607_s1 + $0x2a0] sm:$0xff]  ;;  %v113_v62 = vld [vmem:[%s2607_s1 + $0x2d8] sm:$0xff] }
  0x29   :  { %1062 = vmatpush1.bf16.msra.mxu0 %v1061_v0  ;;  %1254 = vmatpush1.bf16.msra.mxu1 %v1061_v0  ;;  %v90_v0 = vld [vmem:[%s2607_s1 + $0x220] sm:$0xff] }
  0x2a   :  { %1064 = vmatprep.subr.bf16.mxu0 %v1063_v1  ;;  %1256 = vmatprep.subr.bf16.mxu1 %v1063_v1  ;;  %v92_v1 = vld [vmem:[%s2607_s1 + $0x230] sm:$0xff] }
  0x2d   :  { %1066 = vmatpush1.bf16.msra.mxu0 %v1065_v6  ;;  %1258 = vmatpush1.bf16.msra.mxu1 %v1065_v6  ;;  %v275_v6 = vrot.slane %v19_v57, 7 }
  0x2e   :  { %1068 = vmatprep.subr.bf16.mxu0 %v1067_v7  ;;  %1260 = vmatprep.subr.bf16.mxu1 %v1067_v7  ;;  %v1771_v7 = vsel %vm219_vm0, %v224_v34, 0.0  ;;  %v244_v34 = vrot.slane %v1736_v56, 1 }
  0x2f   :  { %v264_v11 = vrot.slane %v1771_v7, 2 }
  0x30   :  { %v246_v51 = vsel %vm240_vm3, %v244_v34, %v245_v33 }
  0x31   :  { %1070 = vmatpush1.bf16.msra.mxu0 %v1069_v12  ;;  %1262 = vmatpush1.bf16.msra.mxu1 %v1069_v12  ;;  %v1783_v12 = vpack.c.bf16 %v92_v1, %v90_v0  ;;  %v1804_v20 = vsel %vm255_vm2, %v260_v49, %v264_v11  ;;  %v104_v49 = vld [vmem:[%s2607_s1 + $0x290] sm:$0xff]  ;;  %v1911_v0 = vpack.c.bf16 %v108_v61, %v106_v59  ;;  %v133_v59 = vld [vmem:[%s2607_s1 + $0x378] sm:$0xff] }
  0x32   :  { %1072 = vmatprep.subr.bf16.mxu0 %v1071_v13  ;;  %1264 = vmatprep.subr.bf16.mxu1 %v1071_v13  ;;  %v1787_v13 = vsel %vm219_vm0, %v275_v6, %v278_v45  ;;  %v1893_v56 = vpack.c.bf16 %v104_v49, %v102_v48  ;;  %v111_v45 = vld [vmem:[%s2607_s1 + $0x2c8] sm:$0xff]  ;;  %v1983_v48 = vpack.c.bf16 %v124_v37, %v122_v36  ;;  %v140_v36 = vld [vmem:[%s2607_s1 + $0x3b0] sm:$0xff] }
  0x33   :  { %v1914_v1 = vpack.c.bf16 %v113_v62, %v111_v45  ;;  %v130_v62 = vld [vmem:[%s2607_s1 + $0x360] sm:$0xff]  ;;  %v143_v37 = vld [vmem:[%s2607_s1 + $0x3c8] sm:$0xff] }
  0x35   :  { %1074 = vmatpush1.bf16.msra.mxu0 %v1073_v18  ;;  %1266 = vmatpush1.bf16.msra.mxu1 %v1073_v18  ;;  %v312_v18 = vrot.slane %v1787_v13, 2 }
  0x36   :  { %1076 = vmatprep.subr.bf16.mxu0 %v1075_v19  ;;  %1268 = vmatprep.subr.bf16.mxu1 %v1075_v19  ;;  %v1801_v19 = vsel %vm219_vm0, %v274_v9, %v276_v2  ;;  %v110_v2 = vld [vmem:[%s2607_s1 + $0x2c0] sm:$0xff] }
  0x37   :  { %v309_v23 = vrot.slane %v1801_v19, 2 }
  0x39   :  { %1078 = vmatpush1.bf16.msra.mxu0 %v1077_v24  ;;  %1270 = vmatpush1.bf16.msra.mxu1 %v1077_v24  ;;  %v1814_v24 = vsel %vm219_vm0, 0.0, %v275_v6  ;;  %v1854_v39 = vsel %vm255_vm2, %v308_v29, %v309_v23  ;;  %v123_v29 = vld [vmem:[%s2607_s1 + $0x328] sm:$0xff] }
  0x3a   :  { %1080 = vmatprep.subr.bf16.mxu0 %v1079_v25  ;;  %1272 = vmatprep.subr.bf16.mxu1 %v1079_v25  ;;  %v1817_v25 = vsel %vm255_vm2, %v257_v54, %v262_v14  ;;  %v311_v27 = vrot.slane %v1814_v24, 2  ;;  %v109_v54 = vld [vmem:[%s2607_s1 + $0x2b8] sm:$0xff]  ;;  %v114_v14 = vld [vmem:[%s2607_s1 + $0x2e0] sm:$0xff] }
  0x3b   :  { %v1896_v57 = vpack.c.bf16 %v109_v54, %v107_v53  ;;  %v1947_v21 = vpack.c.bf16 %v116_v16, %v114_v14  ;;  %v128_v53 = vld [vmem:[%s2607_s1 + $0x350] sm:$0xff]  ;;  %v131_v54 = vld [vmem:[%s2607_s1 + $0x368] sm:$0xff]  ;;  %v134_v16 = vld [vmem:[%s2607_s1 + $0x380] sm:$0xff] }
  0x3c   :  { %v2004_v45 = vpack.c.bf16 %v133_v59, %v131_v54  ;;  %v144_v54 = vld [vmem:[%s2607_s1 + $0x3d0] sm:$0xff]  ;;  %v147_v59 = vld [vmem:[%s2607_s1 + $0x3e8] sm:$0xff] }
  0x3d   :  { %1082 = vmatpush1.bf16.msra.mxu0 %v1081_v32  ;;  %1274 = vmatpush1.bf16.msra.mxu1 %v1081_v32  ;;  %v100_v32 = vld [vmem:[%s2607_s1 + $0x270] sm:$0xff] }
  0x3e   :  { %1084 = vmatprep.subr.bf16.mxu0 %v1083_v35  ;;  %1276 = vmatprep.subr.bf16.mxu1 %v1083_v35  ;;  %v1842_v35 = vsel %vm255_vm2, %v311_v27, %v312_v18  ;;  %v120_v27 = vld [vmem:[%s2607_s1 + $0x310] sm:$0xff] }
  0x41   :  { %1086 = vmatpush1.bf16.msra.mxu0 %v1085_v43  ;;  %1278 = vmatpush1.bf16.msra.mxu1 %v1085_v43  ;;  %v1863_v43 = vpack.c.bf16 %v100_v32, %v98_v31  ;;  %v125_v31 = vld [vmem:[%s2607_s1 + $0x338] sm:$0xff] }
  0x42   :  { %1088 = vmatprep.subr.bf16.mxu0 %v1087_v46  ;;  %1280 = vmatprep.subr.bf16.mxu1 %v1087_v46  ;;  %v314_v46 = vrot.slane %v1859_v40, 2  ;;  %v1968_v34 = vpack.c.bf16 %v125_v31, %v123_v29  ;;  %v138_v31 = vld [vmem:[%s2607_s1 + $0x3a0] sm:$0xff] }
  0x44   :  { %1010 = vmatmul.mubr.msk.f32.vlgmr.msra.gmra.mrb[0].mxu0 %vm1571_vm1, %v220_v41  ;;  %v316_v41 = vrot.slane %v1851_v38, 2  ;;  %v1889_v55 = vsel %vm255_vm2, %v309_v23, %v314_v46  ;;  %v118_v23 = vld [vmem:[%s2607_s1 + $0x300] sm:$0xff]  ;;  %v129_v46 = vld [vmem:[%s2607_s1 + $0x358] sm:$0xff] }
  0x45   :  { %1090 = vmatpush1.bf16.msra.mxu0 %v1745_v60  ;;  %403 = vmatprep.mubr.f32.mxu0 %v1705_v44  ;;  %v1965_v32 = vpack.c.bf16 %v120_v27, %v118_v23  ;;  %v141_v23 = vld [vmem:[%s2607_s1 + $0x3b8] sm:$0xff] }
  0x46   :  { %1092 = vmatprep.subr.bf16.mxu0 %v1752_v63  ;;  %v1880_v52 = vsel %vm255_vm2, %v312_v18, %v316_v41  ;;  %v121_v18 = vld [vmem:[%s2607_s1 + $0x318] sm:$0xff]  ;;  %v127_v41 = vld [vmem:[%s2607_s1 + $0x348] sm:$0xff] }
  0x47   :  { %v1950_v22 = vpack.c.bf16 %v121_v18, %v119_v17  ;;  %v1986_v49 = vpack.c.bf16 %v129_v46, %v127_v41  ;;  %v136_v17 = vld [vmem:[%s2607_s1 + $0x390] sm:$0xff]  ;;  %v139_v18 = vld [vmem:[%s2607_s1 + $0x3a8] sm:$0xff]  ;;  %v145_v41 = vld [vmem:[%s2607_s1 + $0x3d8] sm:$0xff]  ;;  %v2055_v46 = vpack.c.bf16 %v140_v36, %v138_v31  ;;  %v241_v36 = vrot.slane %v1742_v58, 1 }
  0x48   :  { %404 = vmatmul.mubr.f32.gmra.mrb[2].mxu0 %v1715_v50  ;;  %v2037_v27 = vpack.c.bf16 %v136_v17, %v134_v16  ;;  %v2040_v29 = vpack.c.bf16 %v141_v23, %v139_v18  ;;  %v148_v16 = vld [vmem:[%s2607_s1 + $0x3f0] sm:$0xff]  ;;  %v151_v17 = vld [vmem:[%s2607_s1 + $0x408] sm:$0xff]  ;;  %v153_v18 = vld [vmem:[%s2607_s1 + $0x418] sm:$0xff]  ;;  %v242_v23 = vrot.slane %v1715_v50, 1  ;;  %v249_v50 = vrot.slane %v1771_v7, 1 }
  0x49   :  { %1094 = vmatpush1.bf16.msra.mxu0 %v1783_v12  ;;  %1012 = vmatprep.mubr.msk.f32.mxu0 %vm1571_vm1, %v275_v6  ;;  %v117_v6 = vld [vmem:[%s2607_s1 + $0x2f8] sm:$0xff] }
  0x4a   :  { %1096 = vmatprep.subr.bf16.mxu0 %v1791_v15  ;;  %v1932_v11 = vpack.c.bf16 %v117_v6, %v115_v5  ;;  %v137_v5 = vld [vmem:[%s2607_s1 + $0x398] sm:$0xff] }
  0x4b   :  { %v157_v58 = vld [vmem:[%s2607_s1 + $0x438] sm:$0xff] }
  0x4c   :  { %1014 = vmatmul.mubr.msk.f32.gmra.mrb[4].mxu0 %vm1571_vm1, %v274_v9  ;;  %v1929_v9 = vpack.c.bf16 %v112_v4, %v110_v2  ;;  %v132_v2 = vld [vmem:[%s2607_s1 + $0x370] sm:$0xff]  ;;  %v135_v4 = vld [vmem:[%s2607_s1 + $0x388] sm:$0xff] }
  0x4d   :  { %1098 = vmatpush1.bf16.msra.mxu0 %v1825_v28  ;;  %415 = vmatprep.mubr.f32.mxu0 %v1787_v13  ;;  %v2019_v6 = vpack.c.bf16 %v132_v2, %v130_v62  ;;  %v2022_v14 = vpack.c.bf16 %v137_v5, %v135_v4  ;;  %v149_v62 = vld [vmem:[%s2607_s1 + $0x3f8] sm:$0xff]  ;;  %v146_v5 = vld [vmem:[%s2607_s1 + $0x3e0] sm:$0xff] }
  0x4e   :  { %1100 = vmatprep.subr.bf16.mxu0 %v1831_v30  ;;  %v2076_v4 = vpack.c.bf16 %v149_v62, %v147_v59  ;;  %v2092_v31 = vpack.c.bf16 %v148_v16, %v146_v5  ;;  %v243_v59 = vsel %vm240_vm3, %v241_v36, %v242_v23  ;;  %v247_v5 = vrot.slane %v1779_v10, 1 }
  0x4f   :  { %v298_v16 = vrot.slane %v1787_v13, 1  ;;  %v250_v36 = vsel %vm240_vm3, %v245_v33, %v249_v50  ;;  %v297_v10 = vrot.slane %v1814_v24, 1  ;;  %v159_v13 = vld [vmem:[%s2607_s1 + $0x448] sm:$0xff]  ;;  %v294_v24 = vrot.slane %v1821_v26, 1  ;;  %v158_v50 = vld [vmem:[%s2607_s1 + $0x440] sm:$0xff] }
  0x50   :  { %416 = vmatmul.mubr.f32.gmra.mrb[6].mxu0 %v1801_v19  ;;  %v248_v44 = vsel %vm240_vm3, %v242_v23, %v247_v5  ;;  %v163_v26 = vld [vmem:[%s2607_s1 + $0x468] sm:$0xff]  ;;  %v165_v23 = vld [vmem:[%s2607_s1 + $0x478] sm:$0xff] }
  0x51   :  { %1102 = vmatpush1.bf16.msra.mxu0 %v1863_v43  ;;  %486 = vmatprep.mubr.f32.mxu0 %v246_v51  ;;  %v126_v51 = vld [vmem:[%s2607_s1 + $0x340] sm:$0xff] }
  0x52   :  { %1104 = vmatprep.subr.bf16.mxu0 %v1868_v47  ;;  %v2001_v61 = vpack.c.bf16 %v128_v53, %v126_v51  ;;  %v2058_v51 = vpack.c.bf16 %v145_v41, %v143_v37  ;;  %v142_v53 = vld [vmem:[%s2607_s1 + $0x3c0] sm:$0xff]  ;;  %v2096_v37 = vpack.c.bf16 %v153_v18, %v151_v17  ;;  %v156_v18 = vld [vmem:[%s2607_s1 + $0x430] sm:$0xff] }
  0x53   :  { %v2073_v2 = vpack.c.bf16 %v144_v54, %v142_v53  ;;  %v150_v41 = vld [vmem:[%s2607_s1 + $0x400] sm:$0xff]  ;;  %v152_v53 = vld [vmem:[%s2607_s1 + $0x410] sm:$0xff]  ;;  %v155_v54 = vld [vmem:[%s2607_s1 + $0x428] sm:$0xff] }
  0x54   :  { %v2113_v62 = vpack.c.bf16 %v152_v53, %v150_v41  ;;  %v2118_v7 = vpack.c.bf16 %v157_v58, %v155_v54  ;;  %v154_v17 = vld [vmem:[%s2607_s1 + $0x420] sm:$0xff]  ;;  %v161_v41 = vld [vmem:[%s2607_s1 + $0x458] sm:$0xff]  ;;  %v295_v53 = vrot.slane %v1801_v19, 1  ;;  %v160_v19 = vld [vmem:[%s2607_s1 + $0x450] sm:$0xff]  ;;  %v299_v58 = vsel %vm240_vm3, %v297_v10, %v298_v16 }
  0x55   :  { %1106 = vmatpush1.bf16.msra.mxu0 %v1893_v56  ;;  %v2138_v54 = vpack.c.bf16 %v156_v18, %v154_v17  ;;  %v2143_v33 = vpack.c.bf16 %v161_v41, %v159_v13  ;;  %v2160_v5 = vpack.c.bf16 %v160_v19, %v158_v50  ;;  %v300_v18 = vrot.slane %v1859_v40, 1  ;;  %v164_v10 = vld [vmem:[%s2607_s1 + $0x470] sm:$0xff]  ;;  %v167_v41 = vld [vmem:[%s2607_s1 + $0x488] sm:$0xff]  ;;  %v169_v40 = vld [vmem:[%s2607_s1 + $0x498] sm:$0xff] }
  0x56   :  { %1108 = vmatprep.subr.bf16.mxu0 %v1896_v57  ;;  %v296_v17 = vsel %vm240_vm3, %v294_v24, %v295_v53  ;;  %v2185_v50 = vpack.c.bf16 %v169_v40, %v167_v41  ;;  %v168_v19 = vld [vmem:[%s2607_s1 + $0x490] sm:$0xff]  ;;  %v179_v40 = vld [vmem:[%s2607_s1 + $0x4e8] sm:$0xff] }
  0x57   :  { %v301_v24 = vsel %vm240_vm3, %v295_v53, %v300_v18  ;;  %v173_v53 = vld [vmem:[%s2607_s1 + $0x4b8] sm:$0xff]  ;;  %v175_v18 = vld [vmem:[%s2607_s1 + $0x4c8] sm:$0xff]  ;;  %v176_v41 = vld [vmem:[%s2607_s1 + $0x4d0] sm:$0xff] }
  0x58   :  { %2641 = vst [vmem:[#allocation4_spill] sm:$0xff] %v2185_v50 }
  0x59   :  { %1110 = vmatpush1.bf16.msra.mxu0 %v1911_v0 }
  0x5a   :  { %1112 = vmatprep.subr.bf16.mxu0 %v1914_v1 }
  0x5d   :  { %1114 = vmatpush1.bf16.msra.mxu0 %v1929_v9 }
  0x5e   :  { %1116 = vmatprep.subr.bf16.mxu0 %v1932_v11 }
  0x61   :  { %1118 = vmatpush1.bf16.msra.mxu0 %v1947_v21 }
  0x62   :  { %1120 = vmatprep.subr.bf16.mxu0 %v1950_v22 }
  0x65   :  { %1122 = vmatpush1.bf16.msra.mxu0 %v1965_v32 }
  0x66   :  { %1124 = vmatprep.subr.bf16.mxu0 %v1968_v34 }
  0x69   :  { %1126 = vmatpush1.bf16.msra.mxu0 %v1983_v48 }
  0x6a   :  { %1128 = vmatprep.subr.bf16.mxu0 %v1986_v49 }
  0x6d   :  { %1130 = vmatpush1.bf16.msra.mxu0 %v2001_v61 }
  0x6e   :  { %1132 = vmatprep.subr.bf16.mxu0 %v2004_v45 }
  0x71   :  { %1134 = vmatpush1.bf16.msra.mxu0 %v2019_v6 }
  0x72   :  { %1136 = vmatprep.subr.bf16.mxu0 %v2022_v14 }
  0x75   :  { %1138 = vmatpush1.bf16.msra.mxu0 %v2037_v27 }
  0x76   :  { %1140 = vmatprep.subr.bf16.mxu0 %v2040_v29 }
  0x79   :  { %1142 = vmatpush1.bf16.msra.mxu0 %v2055_v46 }
  0x7a   :  { %1144 = vmatprep.subr.bf16.mxu0 %v2058_v51 }
  0x7d   :  { %1146 = vmatpush1.bf16.msra.mxu0 %v2073_v2 }
  0x7e   :  { %1148 = vmatprep.subr.bf16.mxu0 %v2076_v4 }
  0x81   :  { %1150 = vmatpush1.bf16.msra.mxu0 %v2092_v31 }
  0x82   :  { %1152 = vmatprep.subr.bf16.mxu0 %v2096_v37 }
  0x84   :  { %487 = vmatmul.mubr.f32.vlgmr.msra.gmra.mrb[0].mxu0 %v243_v59  ;;  %v302_v59 = vrot.slane %v1851_v38, 1  ;;  %v2165_v38 = vpack.c.bf16 %v165_v23, %v163_v26  ;;  %v170_v23 = vld [vmem:[%s2607_s1 + $0x4a0] sm:$0xff] }
  0x85   :  { %1154 = vmatpush1.bf16.msra.mxu0 %v2113_v62  ;;  %492 = vmatprep.mubr.f32.mxu0 %v250_v36  ;;  %v162_v36 = vld [vmem:[%s2607_s1 + $0x460] sm:$0xff] }
  0x86   :  { %1156 = vmatprep.subr.bf16.mxu0 %v2118_v7  ;;  %2639 = vst [vmem:[#allocation2_spill] sm:$0xff] %v2165_v38  ;;  %v303_v13 = vsel %vm240_vm3, %v298_v16, %v302_v59  ;;  %v166_v16 = vld [vmem:[%s2607_s1 + $0x480] sm:$0xff] }
  0x87   :  { %v2200_v59 = vpack.c.bf16 %v168_v19, %v166_v16 }
  0x88   :  { %493 = vmatmul.mubr.f32.gmra.mrb[2].mxu0 %v248_v44  ;;  %v2181_v44 = vpack.c.bf16 %v164_v10, %v162_v36 }
  0x89   :  { %1158 = vmatpush1.bf16.msra.mxu0 %v2138_v54  ;;  %498 = vmatprep.mubr.f32.mxu0 %v299_v58  ;;  %v171_v58 = vld [vmem:[%s2607_s1 + $0x4a8] sm:$0xff]  ;;  %2642 = vst [vmem:[#allocation5_spill] sm:$0xff] %v2200_v59 }
  0x8a   :  { %1160 = vmatprep.subr.bf16.mxu0 %v2143_v33  ;;  %2640 = vst [vmem:[#allocation3_spill] sm:$0xff] %v2181_v44  ;;  %v2204_v26 = vpack.c.bf16 %v173_v53, %v171_v58  ;;  %v178_v58 = vld [vmem:[%s2607_s1 + $0x4e0] sm:$0xff]  ;;  %v180_v53 = vld [vmem:[%s2607_s1 + $0x4f0] sm:$0xff] }
  0x8c   :  { %499 = vmatmul.mubr.f32.gmra.mrb[4].mxu0 %v296_v17  ;;  %2643 = vst [vmem:[#allocation6_spill] sm:$0xff] %v2204_v26  ;;  %v172_v17 = vld [vmem:[%s2607_s1 + $0x4b0] sm:$0xff] }
  0x8d   :  { %1162 = vmatpush1.bf16.msra.mxu0 %v2160_v5  ;;  %504 = vmatprep.mubr.f32.mxu0 %v303_v13  ;;  %v2219_v36 = vpack.c.bf16 %v172_v17, %v170_v23  ;;  %v174_v13 = vld [vmem:[%s2607_s1 + $0x4c0] sm:$0xff]  ;;  %v183_v23 = vld [vmem:[%s2607_s1 + $0x508] sm:$0xff]  ;;  %v185_v17 = vld [vmem:[%s2607_s1 + $0x518] sm:$0xff] }
  0x8e   :  { %1164 = vmatprep.subr.bf16.mxu0 %v2165_v38  ;;  %v2237_v16 = vpack.c.bf16 %v176_v41, %v174_v13  ;;  %v182_v13 = vld [vmem:[%s2607_s1 + $0x500] sm:$0xff]  ;;  %v184_v41 = vld [vmem:[%s2607_s1 + $0x510] sm:$0xff] }
  0x8f   :  { %2644 = vst [vmem:[#allocation7_spill] sm:$0xff] %v2219_v36 }
  0x90   :  { %505 = vmatmul.mubr.f32.gmra.mrb[6].mxu0 %v301_v24  ;;  %v181_v24 = vld [vmem:[%s2607_s1 + $0x4f8] sm:$0xff]  ;;  %2646 = vst [vmem:[#allocation9_spill] sm:$0xff] %v2237_v16 }
  0x91   :  { %1166 = vmatpush1.bf16.msra.mxu0 %v2181_v44  ;;  %575 = vmatprep.mubr.f32.mxu0 %v1762_v3  ;;  %v177_v3 = vld [vmem:[%s2607_s1 + $0x4d8] sm:$0xff]  ;;  %v2240_v19 = vpack.c.bf16 %v181_v24, %v179_v40  ;;  %v187_v40 = vld [vmem:[%s2607_s1 + $0x528] sm:$0xff] }
  0x92   :  { %1168 = vmatprep.subr.bf16.mxu0 %v2185_v50  ;;  %v2222_v10 = vpack.c.bf16 %v177_v3, %v175_v18  ;;  %v2255_v18 = vpack.c.bf16 %v180_v53, %v178_v58  ;;  %v2258_v3 = vpack.c.bf16 %v185_v17, %v183_v23  ;;  %v189_v24 = vld [vmem:[%s2607_s1 + $0x538] sm:$0xff]  ;;  %v2273_v58 = vpack.c.bf16 %v184_v41, %v182_v13  ;;  %v186_v23 = vld [vmem:[%s2607_s1 + $0x520] sm:$0xff]  ;;  %v188_v17 = vld [vmem:[%s2607_s1 + $0x530] sm:$0xff] }
  0x93   :  { %2647 = vst [vmem:[#allocation10_spill] sm:$0xff] %v2240_v19  ;;  %v2276_v53 = vpack.c.bf16 %v189_v24, %v187_v40  ;;  %v193_v13 = vld [vmem:[%s2607_s1 + $0x558] sm:$0xff]  ;;  %v2291_v41 = vpack.c.bf16 %v188_v17, %v186_v23  ;;  %v190_v24 = vld [vmem:[%s2607_s1 + $0x540] sm:$0xff] }
  0x94   :  { %2645 = vst [vmem:[#allocation8_spill] sm:$0xff] %v2222_v10  ;;  %2648 = vst [vmem:[#allocation11_spill] sm:$0xff] %v2255_v18  ;;  %v197_v23 = vld [vmem:[%s2607_s1 + $0x578] sm:$0xff] }
  0x95   :  { %1170 = vmatpush1.bf16.msra.mxu0 %v2200_v59  ;;  %2649 = vst [vmem:[#allocation12_spill] sm:$0xff] %v2258_v3  ;;  %2650 = vst [vmem:[#allocation13_spill] sm:$0xff] %v2273_v58 }
  0x96   :  { %1172 = vmatprep.subr.bf16.mxu0 %v2204_v26  ;;  %2651 = vst [vmem:[#allocation14_spill] sm:$0xff] %v2276_v53  ;;  %2652 = vst [vmem:[#allocation15_spill] sm:$0xff] %v2291_v41 }
  0x99   :  { %1174 = vmatpush1.bf16.msra.mxu0 %v2219_v36 }
  0x9a   :  { %1176 = vmatprep.subr.bf16.mxu0 %v2222_v10 }
  0x9d   :  { %1178 = vmatpush1.bf16.msra.mxu0 %v2237_v16 }
  0x9e   :  { %1180 = vmatprep.subr.bf16.mxu0 %v2240_v19  ;;  %v191_v19 = vld [vmem:[%s2607_s1 + $0x548] sm:$0xff] }
  0x9f   :  { %v2294_v40 = vpack.c.bf16 %v193_v13, %v191_v19  ;;  %v194_v13 = vld [vmem:[%s2607_s1 + $0x560] sm:$0xff] }
  0xa1   :  { %1182 = vmatpush1.bf16.msra.mxu0 %v2255_v18  ;;  %2653 = vst [vmem:[#allocation16_spill] sm:$0xff] %v2294_v40  ;;  %v195_v18 = vld [vmem:[%s2607_s1 + $0x568] sm:$0xff] }
  0xa2   :  { %1184 = vmatprep.subr.bf16.mxu0 %v2258_v3  ;;  %v192_v3 = vld [vmem:[%s2607_s1 + $0x550] sm:$0xff]  ;;  %v2312_v17 = vpack.c.bf16 %v197_v23, %v195_v18  ;;  %v198_v23 = vld [vmem:[%s2607_s1 + $0x580] sm:$0xff] }
  0xa3   :  { %v2309_v19 = vpack.c.bf16 %v192_v3, %v190_v24  ;;  %v201_v3 = vld [vmem:[%s2607_s1 + $0x598] sm:$0xff] }
  0xa4   :  { %2655 = vst [vmem:[#allocation18_spill] sm:$0xff] %v2312_v17 }
  0xa5   :  { %1186 = vmatpush1.bf16.msra.mxu0 %v2273_v58  ;;  %2654 = vst [vmem:[#allocation17_spill] sm:$0xff] %v2309_v19  ;;  %v199_v58 = vld [vmem:[%s2607_s1 + $0x588] sm:$0xff] }
  0xa6   :  { %1188 = vmatprep.subr.bf16.mxu0 %v2276_v53  ;;  %v196_v53 = vld [vmem:[%s2607_s1 + $0x570] sm:$0xff]  ;;  %v2330_v24 = vpack.c.bf16 %v201_v3, %v199_v58  ;;  %v202_v3 = vld [vmem:[%s2607_s1 + $0x5a0] sm:$0xff] }
  0xa7   :  { %v2327_v18 = vpack.c.bf16 %v196_v53, %v194_v13  ;;  %v205_v53 = vld [vmem:[%s2607_s1 + $0x5b8] sm:$0xff] }
  0xa8   :  { %2657 = vst [vmem:[#allocation20_spill] sm:$0xff] %v2330_v24 }
  0xa9   :  { %1190 = vmatpush1.bf16.msra.mxu0 %v2291_v41  ;;  %2656 = vst [vmem:[#allocation19_spill] sm:$0xff] %v2327_v18  ;;  %v203_v41 = vld [vmem:[%s2607_s1 + $0x5a8] sm:$0xff] }
  0xaa   :  { %1192 = vmatprep.subr.bf16.mxu0 %v2294_v40  ;;  %v200_v40 = vld [vmem:[%s2607_s1 + $0x590] sm:$0xff]  ;;  %v2348_v13 = vpack.c.bf16 %v205_v53, %v203_v41  ;;  %v206_v53 = vld [vmem:[%s2607_s1 + $0x5c0] sm:$0xff] }
  0xab   :  { %v2345_v58 = vpack.c.bf16 %v200_v40, %v198_v23  ;;  %v209_v40 = vld [vmem:[%s2607_s1 + $0x5d8] sm:$0xff] }
  0xac   :  { %2659 = vst [vmem:[#allocation22_spill] sm:$0xff] %v2348_v13 }
  0xad   :  { %1194 = vmatpush1.bf16.msra.mxu0 %v2309_v19  ;;  %2658 = vst [vmem:[#allocation21_spill] sm:$0xff] %v2345_v58  ;;  %v207_v19 = vld [vmem:[%s2607_s1 + $0x5c8] sm:$0xff] }
  0xae   :  { %1196 = vmatprep.subr.bf16.mxu0 %v2312_v17  ;;  %v204_v17 = vld [vmem:[%s2607_s1 + $0x5b0] sm:$0xff]  ;;  %v2366_v23 = vpack.c.bf16 %v209_v40, %v207_v19  ;;  %v210_v40 = vld [vmem:[%s2607_s1 + $0x5e0] sm:$0xff] }
  0xaf   :  { %v2363_v41 = vpack.c.bf16 %v204_v17, %v202_v3  ;;  %v213_v17 = vld [vmem:[%s2607_s1 + $0x5f8] sm:$0xff] }
  0xb0   :  { %2661 = vst [vmem:[#allocation24_spill] sm:$0xff] %v2366_v23 }
  0xb1   :  { %1198 = vmatpush1.bf16.msra.mxu0 %v2327_v18  ;;  %2660 = vst [vmem:[#allocation23_spill] sm:$0xff] %v2363_v41  ;;  %v211_v18 = vld [vmem:[%s2607_s1 + $0x5e8] sm:$0xff] }
  0xb2   :  { %1200 = vmatprep.subr.bf16.mxu0 %v2330_v24  ;;  %v208_v24 = vld [vmem:[%s2607_s1 + $0x5d0] sm:$0xff]  ;;  %v2384_v3 = vpack.c.bf16 %v213_v17, %v211_v18  ;;  %v323_v18 = vlaneseq }
  0xb3   :  { %v2381_v19 = vpack.c.bf16 %v208_v24, %v206_v53  ;;  %v214_v53 = vld [vmem:[%s2609_s2] sm:$0x3] }
  0xb4   :  { %2663 = vst [vmem:[#allocation26_spill] sm:$0xff] %v2384_v3  ;;  %v324_v24 = vshrl.u32 %v323_v18, 7 }
  0xb5   :  { %1202 = vmatpush1.bf16.msra.mxu0 %v2345_v58  ;;  %2662 = vst [vmem:[#allocation25_spill] sm:$0xff] %v2381_v19 }
  0xb6   :  { %1204 = vmatprep.subr.bf16.mxu0 %v2348_v13  ;;  %v212_v13 = vld [vmem:[%s2607_s1 + $0x5f0] sm:$0xff] }
  0xb7   :  { %v2393_v58 = vpack.c.bf16 %v212_v13, %v210_v40  ;;  %v325_v13 = vsub.s32 0, %v324_v24 }
  0xb9   :  { %1206 = vmatpush1.bf16.msra.mxu0 %v2363_v41  ;;  %2664 = vst [vmem:[#allocation27_spill] sm:$0xff] %v2393_v58  ;;  %v2407_v17 = vrot.slane %v214_v53, %v325_v13 }
  0xba   :  { %1208 = vmatprep.subr.bf16.mxu0 %v2366_v23 }
  0xbd   :  { %1210 = vmatpush1.bf16.msra.mxu0 %v2381_v19 }
  0xbe   :  { %1212 = vmatprep.subr.bf16.mxu0 %v2384_v3 }
  0xc1   :  { %1214 = vmatpush1.bf16.msra.mxu0 %v2393_v58 }
  0xc4   :  { %576 = vmatmul.mubr.f32.vlgmr.msra.gmra.mrb[0].mxu0 %v1774_v8  ;;  %v329_v8 = vsub.s32 1, %v324_v24 }
  0xc5   :  { %581 = vmatprep.mubr.f32.mxu0 %v1804_v20 }
  0xc6   :  { %v2409_v20 = vrot.slane %v214_v53, %v329_v8 }
  0xc8   :  { %582 = vmatmul.mubr.f32.gmra.mrb[2].mxu0 %v1817_v25 }
  0xc9   :  { %587 = vmatprep.mubr.f32.mxu0 %v1842_v35 }
  0xcc   :  { %588 = vmatmul.mubr.f32.gmra.mrb[4].mxu0 %v1854_v39 }
  0xcd   :  { %593 = vmatprep.mubr.f32.mxu0 %v1880_v52 }
  0xd0   :  { %594 = vmatmul.mubr.f32.gmra.mrb[6].mxu0 %v1889_v55 }
 0x197   :  { %v577_v25 = vpop.f32.mrb[0].mxu0 }
 0x198   :  { %v1407_v35 = vadd.f32 %v577_v25, %v2407_v17  ;;  %v579_v39 = vpop.f32.mrb[1].mxu0 }
 0x199   :  { %v1408_v52 = vadd.f32 %v579_v39, %v2409_v20 }
 0x19a   :  { %v600_v40 = vmax.f32 %v1407_v35, 0.0 }
 0x19b   :  { %v601_v55 = vmax.f32 %v1408_v52, 0.0  ;;  %v583_v58 = vpop.f32.mrb[2].mxu0 }
 0x19c   :  { %v612_v18 = vrot.slane %v600_v40, 7  ;;  %v1409_v3 = vadd.f32 %v583_v58, %v2407_v17  ;;  %v585_v19 = vpop.f32.mrb[3].mxu0 }
 0x19d   :  { %v613_v23 = vrot.slane %v601_v55, 7  ;;  %v1410_v24 = vadd.f32 %v585_v19, %v2409_v20 }
 0x19e   :  { %v624_v13 = vsel %vm219_vm0, 0.0, %v612_v18  ;;  %v602_v53 = vmax.f32 %v1409_v3, 0.0 }
 0x19f   :  { %v625_v8 = vsel %vm219_vm0, 0.0, %v613_v23  ;;  %v603_v41 = vmax.f32 %v1410_v24, 0.0  ;;  %v589_v25 = vpop.f32.mrb[4].mxu0  ;;  %1016 = vmatprep.mubr.msk.f32.mxu1 %vm1571_vm1, %v613_v23  ;;  %v632_v35 = vrot.slane %v624_v13, 1  ;;  %v646_v58 = vrot.slane %v624_v13, 2 }
 0x1a0   :  { %v614_v39 = vrot.slane %v602_v53, 7  ;;  %v1411_v52 = vadd.f32 %v589_v25, %v2407_v17  ;;  %v591_v40 = vpop.f32.mrb[5].mxu0  ;;  %1018 = vmatmul.mubr.msk.f32.vlgmr.msra.gmra.mrb[0].mxu1 %vm1571_vm1, %v612_v18  ;;  %v635_v3 = vrot.slane %v625_v8, 1  ;;  %v649_v10 = vrot.slane %v625_v8, 2 }
 0x1a1   :  { %v616_v19 = vrot.slane %v603_v41, 7  ;;  %v1412_v55 = vadd.f32 %v591_v40, %v2409_v20  ;;  %1282 = vmatpush1.bf16.msra.mxu1 %v1745_v60 }
 0x1a2   :  { %v626_v24 = vsel %vm219_vm0, %v614_v39, 0.0  ;;  %v604_v16 = vmax.f32 %v1411_v52, 0.0  ;;  %1284 = vmatprep.subr.bf16.mxu1 %v1752_v63  ;;  %v615_v53 = vsel %vm219_vm0, %v612_v18, %v614_v39 }
 0x1a3   :  { %v638_v25 = vrot.slane %v626_v24, 1  ;;  %v652_v36 = vrot.slane %v626_v24, 2  ;;  %v627_v26 = vsel %vm219_vm0, %v616_v19, 0.0  ;;  %v605_v59 = vmax.f32 %v1412_v55, 0.0  ;;  %v595_v13 = vpop.f32.mrb[6].mxu0 }
 0x1a4   :  { %v640_v41 = vrot.slane %v627_v26, 1  ;;  %v654_v50 = vrot.slane %v627_v26, 2  ;;  %v664_v40 = vrot.slane %v604_v16, 7  ;;  %v1413_v60 = vadd.f32 %v595_v13, %v2407_v17  ;;  %v597_v44 = vpop.f32.mrb[7].mxu0 }
 0x1a5   :  { %v665_v38 = vrot.slane %v605_v59, 7  ;;  %v1414_v52 = vadd.f32 %v597_v44, %v2409_v20  ;;  %v617_v63 = vsel %vm219_vm0, %v613_v23, %v616_v19  ;;  %1286 = vmatpush1.bf16.msra.mxu1 %v1783_v12  ;;  %v633_v18 = vrot.slane %v615_v53, 1 }
 0x1a6   :  { %v676_v8 = vsel %vm219_vm0, 0.0, %v664_v40  ;;  %v606_v39 = vmax.f32 %v1413_v60, 0.0  ;;  %v636_v24 = vrot.slane %v617_v63, 1  ;;  %v650_v55 = vrot.slane %v617_v63, 2  ;;  %782 = vmatprep.mubr.f32.mxu1 %v617_v63  ;;  %1288 = vmatprep.subr.bf16.mxu1 %v1791_v15 }
 0x1a7   :  { %v677_v26 = vsel %vm219_vm0, 0.0, %v665_v38  ;;  %v607_v16 = vmax.f32 %v1414_v52, 0.0  ;;  %v647_v13 = vrot.slane %v615_v53, 2  ;;  %783 = vmatmul.mubr.f32.gmra.mrb[2].mxu1 %v615_v53  ;;  %v2436_v44 = vsel %vm240_vm3, %v632_v35, %v633_v18 }
 0x1a8   :  { %v666_v59 = vrot.slane %v606_v39, 7  ;;  %1020 = vmatprep.mubr.msk.f32.mxu1 %vm1571_vm1, %v665_v38  ;;  %v637_v12 = vsel %vm240_vm3, %v635_v3, %v636_v24  ;;  %v2442_v23 = vsel %vm240_vm3, %v636_v24, %v640_v41  ;;  %v2445_v19 = vsel %vm240_vm3, %v633_v18, %v638_v25 }
 0x1a9   :  { %v668_v15 = vrot.slane %v607_v16, 7  ;;  %1290 = vmatpush1.bf16.msra.mxu1 %v1825_v28  ;;  %v687_v60 = vrot.slane %v677_v26, 1  ;;  %v684_v53 = vrot.slane %v676_v8, 1  ;;  %v2449_v35 = vsel %vm255_vm2, %v649_v10, %v650_v55 }
 0x1aa   :  { %v678_v52 = vsel %vm219_vm0, %v666_v59, 0.0  ;;  %1292 = vmatprep.subr.bf16.mxu1 %v1831_v30  ;;  %v667_v3 = vsel %vm219_vm0, %v664_v40, %v666_v59  ;;  %v2455_v41 = vsel %vm255_vm2, %v646_v58, %v647_v13  ;;  %v2458_v25 = vsel %vm255_vm2, %v650_v55, %v654_v50 }
 0x1ab   :  { %v690_v63 = vrot.slane %v678_v52, 1  ;;  %v704_v18 = vrot.slane %v678_v52, 2  ;;  %v679_v28 = vsel %vm219_vm0, %v668_v15, 0.0  ;;  %1022 = vmatmul.mubr.msk.f32.gmra.mrb[4].mxu1 %vm1571_vm1, %v664_v40  ;;  %v669_v10 = vsel %vm219_vm0, %v665_v38, %v668_v15 }
 0x1ac   :  { %v692_v39 = vrot.slane %v679_v28, 1  ;;  %v706_v24 = vrot.slane %v679_v28, 2  ;;  %v688_v30 = vrot.slane %v669_v10, 1  ;;  %v702_v16 = vrot.slane %v669_v10, 2  ;;  %794 = vmatprep.mubr.f32.mxu1 %v669_v10 }
 0x1ad   :  { %1294 = vmatpush1.bf16.msra.mxu1 %v1863_v43  ;;  %v685_v58 = vrot.slane %v667_v3, 1  ;;  %v699_v59 = vrot.slane %v667_v3, 2  ;;  %v2466_v50 = vsel %vm255_vm2, %v647_v13, %v652_v36  ;;  %v701_v55 = vrot.slane %v677_v26, 2  ;;  %v1455_v26 = vld [vmem:[%s2608_s0] sm:$0xff] }
 0x1ae   :  { %1296 = vmatprep.subr.bf16.mxu1 %v1868_v47  ;;  %v689_v42 = vsel %vm240_vm3, %v687_v60, %v688_v30  ;;  %v693_v40 = vsel %vm240_vm3, %v688_v30, %v692_v39  ;;  %v698_v38 = vrot.slane %v676_v8, 2  ;;  %v2472_v15 = vsel %vm255_vm2, %v702_v16, %v706_v24 }
 0x1af   :  { %795 = vmatmul.mubr.f32.gmra.mrb[6].mxu1 %v667_v3  ;;  %v686_v52 = vsel %vm240_vm3, %v684_v53, %v685_v58  ;;  %v691_v43 = vsel %vm240_vm3, %v685_v58, %v690_v63  ;;  %v2477_v28 = vsel %vm255_vm2, %v701_v55, %v702_v16  ;;  %v2480_v36 = vsel %vm255_vm2, %v699_v59, %v704_v18  ;;  %v1458_v63 = vld [vmem:[%s2608_s0 + $0x18] sm:$0xff]  ;;  %v1460_v55 = vld [vmem:[%s2608_s0 + $0x28] sm:$0xff] }
 0x1b0   :  { %865 = vmatprep.mubr.f32.mxu1 %v637_v12  ;;  %v2483_v47 = vsel %vm255_vm2, %v698_v38, %v699_v59  ;;  %v1459_v59 = vld [vmem:[%s2608_s0 + $0x20] sm:$0xff] }
 0x1b1   :  { %1298 = vmatpush1.bf16.msra.mxu1 %v1893_v56  ;;  %v2665_v56 = vld [vmem:[#allocation2_spill] sm:$0xff] }
 0x1b2   :  { %1300 = vmatprep.subr.bf16.mxu1 %v1896_v57  ;;  %v2666_v57 = vld [vmem:[#allocation3_spill] sm:$0xff] }
 0x1b5   :  { %1302 = vmatpush1.bf16.msra.mxu1 %v1911_v0  ;;  %v2667_v0 = vld [vmem:[#allocation4_spill] sm:$0xff] }
 0x1b6   :  { %1304 = vmatprep.subr.bf16.mxu1 %v1914_v1  ;;  %v2668_v1 = vld [vmem:[#allocation5_spill] sm:$0xff] }
 0x1b9   :  { %1306 = vmatpush1.bf16.msra.mxu1 %v1929_v9  ;;  %v2669_v9 = vld [vmem:[#allocation6_spill] sm:$0xff] }
 0x1ba   :  { %1308 = vmatprep.subr.bf16.mxu1 %v1932_v11  ;;  %v2670_v11 = vld [vmem:[#allocation7_spill] sm:$0xff] }
 0x1bd   :  { %1310 = vmatpush1.bf16.msra.mxu1 %v1947_v21  ;;  %v2671_v21 = vld [vmem:[#allocation8_spill] sm:$0xff] }
 0x1be   :  { %1312 = vmatprep.subr.bf16.mxu1 %v1950_v22  ;;  %v2672_v22 = vld [vmem:[#allocation9_spill] sm:$0xff] }
 0x1c1   :  { %1314 = vmatpush1.bf16.msra.mxu1 %v1965_v32  ;;  %v2673_v32 = vld [vmem:[#allocation10_spill] sm:$0xff] }
 0x1c2   :  { %1316 = vmatprep.subr.bf16.mxu1 %v1968_v34  ;;  %v2674_v34 = vld [vmem:[#allocation11_spill] sm:$0xff] }
 0x1c5   :  { %1318 = vmatpush1.bf16.msra.mxu1 %v1983_v48  ;;  %v2675_v48 = vld [vmem:[#allocation12_spill] sm:$0xff] }
 0x1c6   :  { %1320 = vmatprep.subr.bf16.mxu1 %v1986_v49  ;;  %v2676_v49 = vld [vmem:[#allocation13_spill] sm:$0xff] }
 0x1c9   :  { %1322 = vmatpush1.bf16.msra.mxu1 %v2001_v61  ;;  %v2677_v61 = vld [vmem:[#allocation14_spill] sm:$0xff] }
 0x1ca   :  { %1324 = vmatprep.subr.bf16.mxu1 %v2004_v45  ;;  %v2678_v45 = vld [vmem:[#allocation15_spill] sm:$0xff] }
 0x1cd   :  { %1326 = vmatpush1.bf16.msra.mxu1 %v2019_v6  ;;  %v2679_v6 = vld [vmem:[#allocation16_spill] sm:$0xff] }
 0x1ce   :  { %1328 = vmatprep.subr.bf16.mxu1 %v2022_v14  ;;  %v2680_v14 = vld [vmem:[#allocation17_spill] sm:$0xff] }
 0x1d1   :  { %1330 = vmatpush1.bf16.msra.mxu1 %v2037_v27  ;;  %v2681_v27 = vld [vmem:[#allocation18_spill] sm:$0xff] }
 0x1d2   :  { %1332 = vmatprep.subr.bf16.mxu1 %v2040_v29  ;;  %v2682_v29 = vld [vmem:[#allocation19_spill] sm:$0xff] }
 0x1d5   :  { %1334 = vmatpush1.bf16.msra.mxu1 %v2055_v46  ;;  %v2683_v46 = vld [vmem:[#allocation20_spill] sm:$0xff] }
 0x1d6   :  { %1336 = vmatprep.subr.bf16.mxu1 %v2058_v51  ;;  %v2684_v51 = vld [vmem:[#allocation21_spill] sm:$0xff] }
 0x1d9   :  { %1338 = vmatpush1.bf16.msra.mxu1 %v2073_v2  ;;  %v2685_v2 = vld [vmem:[#allocation22_spill] sm:$0xff] }
 0x1da   :  { %1340 = vmatprep.subr.bf16.mxu1 %v2076_v4  ;;  %v2686_v4 = vld [vmem:[#allocation23_spill] sm:$0xff] }
 0x1dd   :  { %1342 = vmatpush1.bf16.msra.mxu1 %v2092_v31  ;;  %v2687_v31 = vld [vmem:[#allocation24_spill] sm:$0xff] }
 0x1de   :  { %1344 = vmatprep.subr.bf16.mxu1 %v2096_v37  ;;  %v2688_v37 = vld [vmem:[#allocation25_spill] sm:$0xff] }
 0x1e0   :  { %866 = vmatmul.mubr.f32.vlgmr.msra.gmra.mrb[0].mxu1 %v2436_v44  ;;  %v1456_v44 = vld [vmem:[%s2608_s0 + $0x8] sm:$0xff] }
 0x1e1   :  { %871 = vmatprep.mubr.f32.mxu1 %v2442_v23  ;;  %1346 = vmatpush1.bf16.msra.mxu1 %v2113_v62  ;;  %v2689_v62 = vld [vmem:[#allocation26_spill] sm:$0xff] }
 0x1e2   :  { %1348 = vmatprep.subr.bf16.mxu1 %v2118_v7  ;;  %v2690_v7 = vld [vmem:[#allocation27_spill] sm:$0xff] }
 0x1e4   :  { %872 = vmatmul.mubr.f32.gmra.mrb[2].mxu1 %v2445_v19 }
 0x1e5   :  { %877 = vmatprep.mubr.f32.mxu1 %v689_v42  ;;  %1350 = vmatpush1.bf16.msra.mxu1 %v2138_v54 }
 0x1e6   :  { %1352 = vmatprep.subr.bf16.mxu1 %v2143_v33 }
 0x1e8   :  { %878 = vmatmul.mubr.f32.gmra.mrb[4].mxu1 %v686_v52 }
 0x1e9   :  { %883 = vmatprep.mubr.f32.mxu1 %v693_v40  ;;  %1354 = vmatpush1.bf16.msra.mxu1 %v2160_v5 }
 0x1ea   :  { %1356 = vmatprep.subr.bf16.mxu1 %v2665_v56 }
 0x1ec   :  { %884 = vmatmul.mubr.f32.gmra.mrb[6].mxu1 %v691_v43 }
 0x1ed   :  { %1358 = vmatpush1.bf16.msra.mxu1 %v2666_v57  ;;  %954 = vmatprep.mubr.f32.mxu1 %v2449_v35 }
 0x1ee   :  { %1360 = vmatprep.subr.bf16.mxu1 %v2667_v0 }
 0x1f1   :  { %1362 = vmatpush1.bf16.msra.mxu1 %v2668_v1 }
 0x1f2   :  { %1364 = vmatprep.subr.bf16.mxu1 %v2669_v9 }
 0x1f5   :  { %1366 = vmatpush1.bf16.msra.mxu1 %v2670_v11 }
 0x1f6   :  { %1368 = vmatprep.subr.bf16.mxu1 %v2671_v21 }
 0x1f9   :  { %1370 = vmatpush1.bf16.msra.mxu1 %v2672_v22 }
 0x1fa   :  { %1372 = vmatprep.subr.bf16.mxu1 %v2673_v32 }
 0x1fd   :  { %1374 = vmatpush1.bf16.msra.mxu1 %v2674_v34 }
 0x1fe   :  { %1376 = vmatprep.subr.bf16.mxu1 %v2675_v48 }
 0x201   :  { %1378 = vmatpush1.bf16.msra.mxu1 %v2676_v49 }
 0x202   :  { %1380 = vmatprep.subr.bf16.mxu1 %v2677_v61 }
 0x205   :  { %1382 = vmatpush1.bf16.msra.mxu1 %v2678_v45 }
 0x206   :  { %1384 = vmatprep.subr.bf16.mxu1 %v2679_v6 }
 0x209   :  { %1386 = vmatpush1.bf16.msra.mxu1 %v2680_v14 }
 0x20a   :  { %1388 = vmatprep.subr.bf16.mxu1 %v2681_v27 }
 0x20d   :  { %1390 = vmatpush1.bf16.msra.mxu1 %v2682_v29 }
 0x20e   :  { %1392 = vmatprep.subr.bf16.mxu1 %v2683_v46 }
 0x211   :  { %1394 = vmatpush1.bf16.msra.mxu1 %v2684_v51 }
 0x212   :  { %1396 = vmatprep.subr.bf16.mxu1 %v2685_v2 }
 0x215   :  { %1398 = vmatpush1.bf16.msra.mxu1 %v2686_v4 }
 0x216   :  { %1400 = vmatprep.subr.bf16.mxu1 %v2687_v31 }
 0x219   :  { %1402 = vmatpush1.bf16.msra.mxu1 %v2688_v37 }
 0x21a   :  { %1404 = vmatprep.subr.bf16.mxu1 %v2689_v62 }
 0x21d   :  { %1406 = vmatpush1.bf16.msra.mxu1 %v2690_v7 }
 0x220   :  { %955 = vmatmul.mubr.f32.vlgmr.msra.gmra.mrb[0].mxu1 %v2455_v41  ;;  %v1457_v41 = vld [vmem:[%s2608_s0 + $0x10] sm:$0xff] }
 0x221   :  { %960 = vmatprep.mubr.f32.mxu1 %v2458_v25 }
 0x224   :  { %961 = vmatmul.mubr.f32.gmra.mrb[2].mxu1 %v2466_v50 }
 0x225   :  { %966 = vmatprep.mubr.f32.mxu1 %v2477_v28 }
 0x228   :  { %967 = vmatmul.mubr.f32.gmra.mrb[4].mxu1 %v2483_v47 }
 0x229   :  { %972 = vmatprep.mubr.f32.mxu1 %v2472_v15 }
 0x22c   :  { %973 = vmatmul.mubr.f32.gmra.mrb[6].mxu1 %v2480_v36  ;;  %v1461_v36 = vld [vmem:[%s2608_s0 + $0x30] sm:$0xff] }
 0x2f3   :  { %v956_v54 = vpop.f32.mrb[0].mxu1 }
 0x2f4   :  { %v1415_v33 = vadd.f32 %v956_v54, %v2407_v17  ;;  %v958_v5 = vpop.f32.mrb[1].mxu1 }
 0x2f5   :  { %v1416_v8 = vadd.f32 %v958_v5, %v2409_v20 }
 0x2f6   :  { %v979_v13 = vadd.f32 %v1455_v26, %v1415_v33 }
 0x2f7   :  { %v980_v12 = vadd.f32 %v1456_v44, %v1416_v8  ;;  %v962_v23 = vpop.f32.mrb[2].mxu1 }
 0x2f8   :  { %v987_v19 = vmax.f32 %v979_v13, 0.0  ;;  %v1417_v60 = vadd.f32 %v962_v23, %v2407_v17  ;;  %v964_v53 = vpop.f32.mrb[3].mxu1 }
 0x2f9   :  { %v988_v35 = vmax.f32 %v980_v12, 0.0  ;;  %v1418_v3 = vadd.f32 %v964_v53, %v2409_v20 }
 0x2fa   :  { %995 = vst [vmem:[%s2610_s3] sm:$0xff] %v987_v19  ;;  %v981_v25 = vadd.f32 %v1457_v41, %v1417_v60 }
 0x2fb   :  { %996 = vst [vmem:[%s2610_s3 + $0x8] sm:$0xff] %v988_v35  ;;  %v982_v18 = vadd.f32 %v1458_v63, %v1418_v3  ;;  %v968_v10 = vpop.f32.mrb[4].mxu1 }
 0x2fc   :  { %v989_v39 = vmax.f32 %v981_v25, 0.0  ;;  %v1419_v24 = vadd.f32 %v968_v10, %v2407_v17  ;;  %v970_v30 = vpop.f32.mrb[5].mxu1 }
 0x2fd   :  { %v990_v16 = vmax.f32 %v982_v18, 0.0  ;;  %v1420_v58 = vadd.f32 %v970_v30, %v2409_v20 }
 0x2fe   :  { %997 = vst [vmem:[%s2610_s3 + $0x10] sm:$0xff] %v989_v39  ;;  %v983_v50 = vadd.f32 %v1459_v59, %v1419_v24 }
 0x2ff   :  { %998 = vst [vmem:[%s2610_s3 + $0x18] sm:$0xff] %v990_v16  ;;  %v984_v42 = vadd.f32 %v1460_v55, %v1420_v58  ;;  %v974_v40 = vpop.f32.mrb[6].mxu1 }
 0x300   :  { %v991_v38 = vmax.f32 %v983_v50, 0.0  ;;  %v1421_v15 = vadd.f32 %v974_v40, %v2407_v17  ;;  %v976_v52 = vpop.f32.mrb[7].mxu1  ;;  %v1462_v17 = vld [vmem:[%s2608_s0 + $0x38] sm:$0xff] }
 0x301   :  { %v992_v43 = vmax.f32 %v984_v42, 0.0  ;;  %v1422_v28 = vadd.f32 %v976_v52, %v2409_v20 }
 0x302   :  { %999 = vst [vmem:[%s2610_s3 + $0x20] sm:$0xff] %v991_v38  ;;  %v985_v47 = vadd.f32 %v1461_v36, %v1421_v15 }
 0x303   :  { %1000 = vst [vmem:[%s2610_s3 + $0x28] sm:$0xff] %v992_v43  ;;  %v986_v56 = vadd.f32 %v1462_v17, %v1422_v28 }
 0x304   :  { %v993_v57 = vmax.f32 %v985_v47, 0.0 }
 0x305   :  { %v994_v20 = vmax.f32 %v986_v56, 0.0 }
 0x306   :  { %1001 = vst [vmem:[%s2610_s3 + $0x30] sm:$0xff] %v993_v57 }
 0x307   :  { %1002 = vst [vmem:[%s2610_s3 + $0x38] sm:$0xff] %v994_v20 }

</bundles_post_ra>
